<compile_context>
chip_gen: v7x
topology: tpu7x:2x2x1
jax: 0.10.0
libtpu: 0.0.40
codegen_flags: <defaults>
</compile_context>

<pallas_src>
import jax
import jax.numpy as jnp
import numpy as np
from jax.experimental import pallas as pl
from jax.experimental.pallas import tpu as pltpu

_EPS = 1e-8  # torch.nn.CosineSimilarity default eps
_VMEM_LIMIT_BYTES = 32 * 1024 * 1024
_MASK_TILE_BUDGET_BYTES = 24 * 1024 * 1024  # 2 masks x 2 pipeline buffers x f32 tile


def _round_up(x, m):
    return ((x + m - 1) // m) * m


def _pick_row_tile(n_pad):
    """Largest multiple-of-8 divisor of n_pad whose streamed mask tiles fit the budget."""
    cap = max(8, _MASK_TILE_BUDGET_BYTES // (16 * n_pad))  # 16 = 2 masks * 2 bufs * 4 B
    cap = int(min(cap, n_pad, 1024))
    best = 8
    for t in range(8, cap + 1, 8):
        if n_pad % t == 0:
            best = t
    return best


# ---------------------------------------------------------------------------
# Kernel 1: build cat_n = row-normalized concat(softmax(output), one_hot) once.
# ---------------------------------------------------------------------------
def _make_prep_kernel(B, C, N, N_pad):
    def kernel(logits_ref, onehot_ref, cat_f32_ref, cat_bf16_ref):
        logits = logits_ref[...]                                     # (B, C)
        m = jnp.max(logits, axis=1, keepdims=True)
        e = jnp.exp(logits - m)
        denom = jnp.sum(e, axis=1, keepdims=True)
        # EUP reciprocal: the per-row scale error cancels exactly under the
        # L2 row normalization below (cosine similarity is scale invariant).
        sm = e * pl.reciprocal(denom, approx=True)

        # L2 row-normalize with rsqrt; clamp the *squared* norm at eps^2 to
        # preserve torch CosineSimilarity's eps-on-norm semantics.
        sq = jnp.sum(sm * sm, axis=1, keepdims=True)
        sm_n = sm * jax.lax.rsqrt(jnp.maximum(sq, _EPS * _EPS))

        cat_f32_ref[pl.ds(0, B), :] = sm_n
        # one_hot is the identity by module construction -> rows already have
        # unit norm, so CosineSimilarity normalization is a no-op for them.
        cat_f32_ref[pl.ds(B, C), :] = onehot_ref[...]
        if N_pad > N:  # padded tail rows only ever meet zero mask entries
            cat_f32_ref[pl.ds(N, N_pad - N), :] = jnp.zeros(
                (N_pad - N, C), jnp.float32)

        # Hoist the bf16 cast of the matmul RHS out of the streaming loop.
        cat_bf16_ref[...] = cat_f32_ref[...].astype(jnp.bfloat16)

    return kernel


# ---------------------------------------------------------------------------
# Kernel 2: stream (T, N) mask row tiles; per-tile masked partial sums.
#   sum(sim * M) over a row tile == sum(cat_rows * (M_tile @ cat_n))
# ---------------------------------------------------------------------------
def _make_masked_sum_kernel(T):
    def kernel(cat_f32_ref, cat_bf16_ref, pos_ref, neg_ref, part_ref):
        t = pl.program_id(0)
        r0 = pl.multiple_of(t * T, 8)

        cat_rows = cat_f32_ref[pl.ds(r0, T), :]          # (T, C) f32 rows of this tile
        cat_b = cat_bf16_ref[...]                        # (N_pad, C) bf16, resident

        pos_t = pos_ref[...].astype(jnp.bfloat16)        # (T, N_pad)
        neg_t = neg_ref[...].astype(jnp.bfloat16)

        mp = jnp.dot(pos_t, cat_b, preferred_element_type=jnp.float32)  # (T, C)
        mn = jnp.dot(neg_t, cat_b, preferred_element_type=jnp.float32)  # (T, C)

        part_ref[0, 0, 0] = jnp.sum(cat_rows * mp)       # pos partial
        part_ref[0, 0, 1] = jnp.sum(cat_rows * mn)       # neg partial

    return kernel


def contrastive_supervision_loss(output, one_hot, pos_mask, neg_mask, *, row_tile=None):
    """output: (B, C) logits; one_hot: (C, C) identity; masks: (N, N), N = B + C."""
    output = output.astype(jnp.float32)
    one_hot = one_hot.astype(jnp.float32)
    pos_mask = pos_mask.astype(jnp.float32)
    neg_mask = neg_mask.astype(jnp.float32)

    B, C = output.shape
    N = B + C
    assert one_hot.shape == (C, C)
    assert pos_mask.shape == (N, N) and neg_mask.shape == (N, N)

    if row_tile is None:
        N_pad = _round_up(N, 8)
        T = _pick_row_tile(N_pad)
    else:
        T = _round_up(int(row_tile), 8)
        N_pad = _round_up(N, T)
    num_tiles = N_pad // T

    if N_pad != N:
        pad = N_pad - N
        pos_mask = jnp.pad(pos_mask, ((0, pad), (0, pad)))
        neg_mask = jnp.pad(neg_mask, ((0, pad), (0, pad)))

    # ---- kernel 1: tiny, single block ----
    cat_f32, cat_bf16 = pl.pallas_call(
        _make_prep_kernel(B, C, N, N_pad),
        out_shape=(
            jax.ShapeDtypeStruct((N_pad, C), jnp.float32),
            jax.ShapeDtypeStruct((N_pad, C), jnp.bfloat16),
        ),
        in_specs=[
            pl.BlockSpec(memory_space=pltpu.MemorySpace.VMEM),
            pl.BlockSpec(memory_space=pltpu.MemorySpace.VMEM),
        ],
        out_specs=(
            pl.BlockSpec(memory_space=pltpu.MemorySpace.VMEM),
            pl.BlockSpec(memory_space=pltpu.MemorySpace.VMEM),
        ),
    )(output, one_hot)

    # ---- kernel 2: gridded mask streaming, per-tile partials ----
    partials = pl.pallas_call(
        _make_masked_sum_kernel(T),
        out_shape=jax.ShapeDtypeStruct((num_tiles, 1, 2), jnp.float32),
        grid=(num_tiles,),
        in_specs=[
            pl.BlockSpec((N_pad, C), lambda t: (0, 0)),   # cat_n f32 (resident)
            pl.BlockSpec((N_pad, C), lambda t: (0, 0)),   # cat_n bf16 (resident)
            pl.BlockSpec((T, N_pad), lambda t: (t, 0)),   # pos_mask row tile
            pl.BlockSpec((T, N_pad), lambda t: (t, 0)),   # neg_mask row tile
        ],
        out_specs=pl.BlockSpec((1, 1, 2), lambda t: (t, 0, 0)),
        compiler_params=pltpu.CompilerParams(
            dimension_semantics=("parallel",),            # independent tiles -> 2 TCs on v7x
            vmem_limit_bytes=_VMEM_LIMIT_BYTES,
        ),
    )(cat_f32, cat_bf16, pos_mask, neg_mask)

    sums = jnp.sum(partials, axis=(0, 1))                 # (pos_sum, neg_sum)
    return sums[1] / sums[0]


# --------------- plain-JAX glue: mask construction (mirrors _prepare_data_mask) ---------------
def prepare_data_mask(y, num_class):
    one_hot = jnp.eye(num_class, dtype=jnp.float32)
    B = y.shape[0]
    N = B + num_class
    cat = jnp.concatenate([one_hot[y], one_hot], axis=0)
    norm = jnp.maximum(jnp.linalg.norm(cat, axis=-1, keepdims=True), _EPS)
    cat_n = cat / norm
    sim = cat_n @ cat_n.T
    pos_mask = sim - jnp.eye(N, dtype=jnp.float32)
    pos_mask = pos_mask.at[:B, :B].set(0.0)
    neg_mask = 1.0 - sim
    neg_mask = neg_mask.at[B:, B:].set(0.0)
    neg_mask = neg_mask.at[:B, :B].set(0.0)
    return pos_mask, neg_mask


def reference_loss(output, one_hot, pos_mask, neg_mask):
    sm = jax.nn.softmax(output, axis=1)
    cat = jnp.concatenate([sm, one_hot], axis=0)
    norm = jnp.maximum(jnp.linalg.norm(cat, axis=-1, keepdims=True), _EPS)
    cat_n = cat / norm
    sim = cat_n @ cat_n.T
    return jnp.sum(sim * neg_mask) / jnp.sum(sim * pos_mask)


if __name__ == "__main__":
    B, C = 24, 8  # batch, num_class -> N = 32

    key = jax.random.PRNGKey(0)
    k1, k2 = jax.random.split(key)
    output = jax.random.normal(k1, (B, C), dtype=jnp.float32)      # logits
    y = jax.random.randint(k2, (B,), 0, C, dtype=jnp.int32)        # labels

    one_hot = jnp.eye(C, dtype=jnp.float32)
    pos_mask, neg_mask = prepare_data_mask(y, C)

    # row_tile=8 -> a 4-step streaming grid even at this toy size.
    ratio = contrastive_supervision_loss(output, one_hot, pos_mask, neg_mask, row_tile=8)
    ratio = jax.block_until_ready(ratio)

    ref = reference_loss(output, one_hot, pos_mask, neg_mask)
    # bf16 MXU operands (f32 accumulation) trade ~1e-3 relative precision.
    assert np.allclose(np.asarray(ratio), np.asarray(ref), rtol=1e-2, atol=1e-2), (ratio, ref)

    print("KERNEL_OK")
</pallas_src>

<mosaic_0001>
module attributes {stable_mosaic.version = 11 : i64} {
  func.func @kernel(%arg0: memref<24x8xf32, #tpu.memory_space<vmem>>, %arg1: memref<8x8xf32, #tpu.memory_space<vmem>>, %arg2: memref<32x8xf32, #tpu.memory_space<vmem>>, %arg3: memref<32x8xbf16, #tpu.memory_space<vmem>>) attributes {dimension_semantics = [], scalar_prefetch = 0 : i64, scratch_operands = 0 : i64, tpu.core_type = #tpu.core_type<tc>} {
    %c0 = arith.constant 0 : index
    %c0_0 = arith.constant 0 : index
    %0 = vector.load %arg0[%c0, %c0_0] : memref<24x8xf32, #tpu.memory_space<vmem>>, vector<24x8xf32>
    %cst = arith.constant dense<0xFF800000> : vector<24xf32>
    %1 = vector.multi_reduction <maximumf>, %0, %cst [1] : vector<24x8xf32> to vector<24xf32>
    %2 = vector.shape_cast %1 : vector<24xf32> to vector<24x1xf32>
    %3 = vector.broadcast %2 : vector<24x1xf32> to vector<24x8xf32>
    %4 = arith.subf %0, %3 : vector<24x8xf32>
    %5 = math.exp %4 : vector<24x8xf32>
    %cst_1 = arith.constant dense<0.000000e+00> : vector<24xf32>
    %6 = vector.multi_reduction <add>, %5, %cst_1 [1] : vector<24x8xf32> to vector<24xf32>
    %7 = vector.shape_cast %6 : vector<24xf32> to vector<24x1xf32>
    %8 = tpu.reciprocal %7 {approx = true} : vector<24x1xf32> -> vector<24x1xf32>
    %9 = vector.broadcast %8 : vector<24x1xf32> to vector<24x8xf32>
    %10 = arith.mulf %5, %9 : vector<24x8xf32>
    %11 = arith.mulf %10, %10 : vector<24x8xf32>
    %cst_2 = arith.constant dense<0.000000e+00> : vector<24xf32>
    %12 = vector.multi_reduction <add>, %11, %cst_2 [1] : vector<24x8xf32> to vector<24xf32>
    %13 = vector.shape_cast %12 : vector<24xf32> to vector<24x1xf32>
    %cst_3 = arith.constant 1.000000e-16 : f32
    %14 = vector.broadcast %cst_3 : f32 to vector<24x1xf32>
    %15 = arith.maximumf %13, %14 : vector<24x1xf32>
    %16 = math.rsqrt %15 : vector<24x1xf32>
    %17 = vector.broadcast %16 : vector<24x1xf32> to vector<24x8xf32>
    %18 = arith.mulf %10, %17 : vector<24x8xf32>
    %c0_4 = arith.constant 0 : index
    %c0_5 = arith.constant 0 : index
    %19 = vector.load %arg2[%c0_4, %c0_5] : memref<32x8xf32, #tpu.memory_space<vmem>>, vector<24x8xf32>
    tpu.vector_store %arg2[%c0_4, %c0_5], %18 {strides = array<i32>} : memref<32x8xf32, #tpu.memory_space<vmem>>, vector<24x8xf32>,
    %c0_6 = arith.constant 0 : index
    %c0_7 = arith.constant 0 : index
    %20 = vector.load %arg1[%c0_6, %c0_7] : memref<8x8xf32, #tpu.memory_space<vmem>>, vector<8x8xf32>
    %c24 = arith.constant 24 : index
    %c0_8 = arith.constant 0 : index
    %21 = vector.load %arg2[%c24, %c0_8] : memref<32x8xf32, #tpu.memory_space<vmem>>, vector<8x8xf32>
    tpu.vector_store %arg2[%c24, %c0_8], %20 {strides = array<i32>} : memref<32x8xf32, #tpu.memory_space<vmem>>, vector<8x8xf32>,
    %c0_9 = arith.constant 0 : index
    %c0_10 = arith.constant 0 : index
    %22 = vector.load %arg2[%c0_9, %c0_10] : memref<32x8xf32, #tpu.memory_space<vmem>>, vector<32x8xf32>
    %23 = arith.truncf %22 : vector<32x8xf32> to vector<32x8xbf16>
    %c0_11 = arith.constant 0 : index
    %c0_12 = arith.constant 0 : index
    %24 = vector.load %arg3[%c0_11, %c0_12] : memref<32x8xbf16, #tpu.memory_space<vmem>>, vector<32x8xbf16>
    tpu.vector_store %arg3[%c0_11, %c0_12], %23 {strides = array<i32>} : memref<32x8xbf16, #tpu.memory_space<vmem>>, vector<32x8xbf16>,
    return
  }
}

</mosaic_0001>

<bundles_post_ra>
// kernel: tpu_custom_call.1
= control target key start
LH: loop header
LB: loop body
LE: loop exit
PB: predicated region body
PF: predicated region fallthrough
CT: control target
= control target key end

     0   :  { %vm16_vm0 = vcmask 64512   ;;  %vm96_vm1 = vcmask 60416   ;;  %s220_s0 = inlined_call_operand.vmem [shape: f32[24,8], index: 0, kind: input, shape index: {}]   ;;  %s221_s1 = inlined_call_operand.vmem [shape: f32[8,8], index: 1, kind: input, shape index: {}]   ;;  %s222_s2 = inlined_call_operand.vmem [shape: f32[32,8], index: 2, kind: output, shape index: {0}]   ;;  %s223_s3 = inlined_call_operand.vmem [shape: bf16[32,8], index: 3, kind: output, shape index: {1}]  }
   0x1   :  { %v13_v0 = vld [vmem:[%s220_s0] sm:$0xff]  ;;  %v15_v1 = vld [vmem:[%s220_s0 + $0x10] sm:$0xff]  ;;  %v14_v2 = vld [vmem:[%s220_s0 + $0x8] sm:$0xff] }
   0x2   :  { %v17_v3 = vsel %vm16_vm0, %v13_v0, -inf  ;;  %v23_v4 = vsel %vm16_vm0, %v15_v1, -inf  ;;  %v20_v5 = vsel %vm16_vm0, %v14_v2, -inf  ;;  %v74_v21 = vld [vmem:[%s221_s1] sm:$0xff] }
   0x3   :  { %18 = vmax.xlane.f32.xlu0 %v17_v3  ;;  %24 = vmax.xlane.f32.xlu1 %v23_v4  ;;  %75 = vst.msk [vmem:[%s222_s2 + $0x18] sm:$0xff] %vm16_vm0, %v74_v21 }
   0x7   :  { %21 = vmax.xlane.f32.xlu0 %v20_v5 }
   0xa   :  { %v79_v22 = vld [vmem:[%s222_s2 + $0x18] sm:$0xff] }
   0xb   :  { %v116_v23 = vpack.c.bf16 %v79_v22, %v79_v22 }
   0xd   :  { %100 = vst.msk [vmem:[%s223_s3 + $0xc] sm:$0xf] %vm96_vm1, %v116_v23 }
  0x90   :  { %v19_v6 = vpop.xlane.xlu0 %18  ;;  %v25_v7 = vpop.xlane.xlu1 %24 }
  0x91   :  { %v26_v8 = vsub.f32 %v13_v0, %v19_v6  ;;  %v28_v9 = vsub.f32 %v15_v1, %v25_v7 }
  0x93   :  { %v29_v10 = vmul.f32 1.442695, %v26_v8  ;;  %v33_v11 = vmul.f32 1.442695, %v28_v9 }
  0x94   :  { %v22_v12 = vpop.xlane.xlu0 %21 }
  0x95   :  { %117 = vpow2.f32 %v29_v10  ;;  %v27_v13 = vsub.f32 %v14_v2, %v22_v12 }
  0x96   :  { %119 = vpow2.f32 %v33_v11 }
  0x97   :  { %v31_v14 = vmul.f32 1.442695, %v27_v13 }
  0x99   :  { %121 = vpow2.f32 %v31_v14 }
  0x9f   :  { %v118_v15 = vpop.eup %117 }
  0xa0   :  { %v120_v16 = vpop.eup %119  ;;  %v35_v17 = vsel %vm16_vm0, %v118_v15, 0.0 }
  0xa1   :  { %36 = vadd.xlane.f32.xlu1 %v35_v17  ;;  %v41_v18 = vsel %vm16_vm0, %v120_v16, 0.0 }
  0xa3   :  { %v122_v19 = vpop.eup %121 }
  0xa4   :  { %v38_v20 = vsel %vm16_vm0, %v122_v19, 0.0 }
  0xa5   :  { %42 = vadd.xlane.f32.xlu1 %v41_v18  ;;  %39 = vadd.xlane.f32.xlu0 %v38_v20 }
 0x12e   :  { %v37_v24 = vpop.xlane.xlu1 %36 }
 0x12f   :  { %123 = vrcp.f32 %v37_v24 }
 0x132   :  { %v43_v25 = vpop.xlane.xlu1 %42  ;;  %v40_v26 = vpop.xlane.xlu0 %39 }
 0x133   :  { %125 = vrcp.f32 %v43_v25 }
 0x134   :  { %127 = vrcp.f32 %v40_v26 }
 0x139   :  { %v124_v27 = vpop.eup %123 }
 0x13a   :  { %v47_v28 = vmul.f32 %v124_v27, %v118_v15 }
 0x13c   :  { %v50_v29 = vmul.f32 %v47_v28, %v47_v28 }
 0x13d   :  { %v126_v30 = vpop.eup %125 }
 0x13e   :  { %v128_v31 = vpop.eup %127  ;;  %v53_v32 = vsel %vm16_vm0, %v50_v29, 0.0  ;;  %v49_v33 = vmul.f32 %v126_v30, %v120_v16 }
 0x13f   :  { %54 = vadd.xlane.f32.xlu0 %v53_v32  ;;  %v48_v34 = vmul.f32 %v128_v31, %v122_v19 }
 0x140   :  { %v52_v35 = vmul.f32 %v49_v33, %v49_v33 }
 0x141   :  { %v51_v36 = vmul.f32 %v48_v34, %v48_v34 }
 0x142   :  { %v59_v37 = vsel %vm16_vm0, %v52_v35, 0.0 }
 0x143   :  { %60 = vadd.xlane.f32.xlu0 %v59_v37  ;;  %v56_v38 = vsel %vm16_vm0, %v51_v36, 0.0 }
 0x144   :  { %57 = vadd.xlane.f32.xlu1 %v56_v38 }
 0x1cc   :  { %v55_v39 = vpop.xlane.xlu0 %54 }
 0x1cd   :  { %v62_v40 = vmax.f32 %v55_v39, 1e-16 }
 0x1cf   :  { %129 = vrsqrt.f32 %v62_v40 }
 0x1d0   :  { %v61_v41 = vpop.xlane.xlu0 %60 }
 0x1d1   :  { %v58_v42 = vpop.xlane.xlu1 %57  ;;  %v64_v43 = vmax.f32 %v61_v41, 1e-16 }
 0x1d2   :  { %v63_v44 = vmax.f32 %v58_v42, 1e-16 }
 0x1d3   :  { %131 = vrsqrt.f32 %v64_v43 }
 0x1d4   :  { %133 = vrsqrt.f32 %v63_v44 }
 0x1d9   :  { %v130_v45 = vpop.eup %129 }
 0x1da   :  { %v68_v46 = vmul.f32 %v130_v45, %v47_v28 }
 0x1dc   :  { %71 = vst.msk [vmem:[%s222_s2] sm:$0xff] %vm16_vm0, %v68_v46 }
 0x1dd   :  { %v132_v47 = vpop.eup %131 }
 0x1de   :  { %v134_v48 = vpop.eup %133  ;;  %v70_v49 = vmul.f32 %v132_v47, %v49_v33 }
 0x1df   :  { %v69_v50 = vmul.f32 %v134_v48, %v48_v34 }
 0x1e0   :  { %73 = vst.msk [vmem:[%s222_s2 + $0x10] sm:$0xff] %vm16_vm0, %v70_v49 }
 0x1e1   :  { %72 = vst.msk [vmem:[%s222_s2 + $0x8] sm:$0xff] %vm16_vm0, %v69_v50 }
 0x1e3   :  { %v76_v51 = vld [vmem:[%s222_s2] sm:$0xff] }
 0x1e4   :  { %v113_v52 = vpack.c.bf16 %v76_v51, %v76_v51 }
 0x1e6   :  { %97 = vst.msk [vmem:[%s223_s3] sm:$0xf] %vm96_vm1, %v113_v52 }
 0x1e7   :  { %v78_v53 = vld [vmem:[%s222_s2 + $0x10] sm:$0xff] }
 0x1e8   :  { %v77_v54 = vld [vmem:[%s222_s2 + $0x8] sm:$0xff]  ;;  %v115_v55 = vpack.c.bf16 %v78_v53, %v78_v53 }
 0x1e9   :  { %v114_v56 = vpack.c.bf16 %v77_v54, %v77_v54 }
 0x1ea   :  { %99 = vst.msk [vmem:[%s223_s3 + $0x8] sm:$0xf] %vm96_vm1, %v115_v55 }
 0x1eb   :  { %98 = vst.msk [vmem:[%s223_s3 + $0x4] sm:$0xf] %vm96_vm1, %v114_v56 }

</bundles_post_ra>
